<compile_context>
chip_gen: v7x
topology: tpu7x:2x2x1
jax: 0.10.0
libtpu: 0.0.40
codegen_flags: <defaults>
</compile_context>

<pallas_src>
import numpy as np
import jax
import jax.numpy as jnp
from jax import lax
from jax.experimental import pallas as pl
from jax.experimental.pallas import tpu as pltpu

# Globals mirroring the PyTorch script's module-level constants.
HEADS = 4
TOKEN_DIM = 32
OPTION_NUM = 4

IN_CHANNELS = 16
OUT_CHANNELS = 32
D_K = OUT_CHANNELS // HEADS


def _graph_transformer_kernel(
    x_ref, ec_ref, rowt_ref, grp_ref, sentp_ref,
    wx_ref, bx_ref, wo_ref, bo_ref, bd_ref,
    out_ref,
):
    f32 = jnp.float32
    x = x_ref[...]                      # [N, F_in] f32
    N = x.shape[0]
    E = ec_ref.shape[0]
    G = sentp_ref.shape[0]
    F = OUT_CHANNELS

    # ---- Fused node projections: single lane-dense [N,F_in]x[F_in,4F] matmul.
    P = jnp.dot(x, wx_ref[...], preferred_element_type=f32) + bx_ref[...]    # [N, 4F]
    res = P[:, 3 * F:4 * F]             # residual_lin(x)

    # ---- sentence gather: QS = one_hot(group) @ (SE @ ws + bs)  (pre-folded).
    grp = grp_ref[...]                                              # [N, 1] int32
    g_iota = lax.broadcasted_iota(jnp.int32, (N, G), 1)
    oh_g = (grp == g_iota).astype(f32)                              # [N, G]
    QS = jnp.dot(oh_g, sentp_ref[...], preferred_element_type=f32)  # [N, F]; K_sentence == Q_sentence

    # ---- Edge gathers from a single 128-lane source [Q | K | V | QS].
    src = jnp.concatenate([P[:, 0:3 * F], QS], axis=1)              # [N, 4F] = 128 lanes
    ec = ec_ref[...]                                                # [E, 2] int32
    row = ec[:, 0:1]
    col = ec[:, 1:2]
    n_iota = lax.broadcasted_iota(jnp.int32, (E, N), 1)
    oh_row = (row == n_iota).astype(f32)                            # [E, N]
    oh_col = (col == n_iota).astype(f32)
    Gr = jnp.dot(oh_row, src, preferred_element_type=f32)           # [E, 4F]
    Gc = jnp.dot(oh_col, src, preferred_element_type=f32)           # [E, 4F]
    Q_i = Gr[:, 0:F]
    QS_i = Gr[:, 3 * F:4 * F]
    K_j = Gc[:, F:2 * F]
    V_j = Gc[:, 2 * F:3 * F]
    KS_j = Gc[:, 3 * F:4 * F]

    # ---- Attention logits: three terms fused, then ONE block-diagonal [F,F]
    # matmul (scale folded in) broadcasts the per-head sum to full lane width.
    prod = Q_i * (K_j + KS_j) + QS_i * K_j                          # [E, F]
    alpha = jnp.dot(prod, bd_ref[...], preferred_element_type=f32)  # [E, F], head logit per lane

    # leaky_relu(0.2) + softmax over ALL edges (dim 0), per head, in f32 at
    # full lane width (commutes with the per-head lane broadcast).
    alpha = jnp.where(alpha > 0, alpha, 0.2 * alpha)
    alpha = jnp.exp(alpha - jnp.max(alpha, axis=0, keepdims=True))
    alpha = alpha / jnp.sum(alpha, axis=0, keepdims=True)           # exact normalization
    msg = V_j * alpha                                               # [E, F]

    # ---- Scatter-add into destination nodes via a directly-built transposed
    # one-hot [N, E] (plain matmul; no XLU transpose of the [E, N] mask).
    rowt = rowt_ref[...]                                            # [1, E] int32
    node_iota = lax.broadcasted_iota(jnp.int32, (N, E), 0)
    oh_rowT = (rowt == node_iota).astype(f32)                       # [N, E]
    out_nodes = jnp.dot(oh_rowT, msg, preferred_element_type=f32)   # [N, F]

    out = jnp.dot(out_nodes, wo_ref[...], preferred_element_type=f32) + bo_ref[...]
    out_ref[...] = out + res


def graph_transformer_layer(x, edge_index, sentence_embeddings, batch, params):
    N = x.shape[0]
    E = edge_index.shape[1]
    F = OUT_CHANNELS

    ec = edge_index.astype(jnp.int32).T                             # [E, 2] = (row, col)
    row_t = edge_index[0].astype(jnp.int32).reshape(1, E)           # [1, E]
    grp = (batch // OPTION_NUM).astype(jnp.int32).reshape(N, 1)     # [N, 1]

    # Host-side fusion of the four x-projections and bias packing.
    w_x = jnp.concatenate(
        [params["wq"], params["wk"], params["wv"], params["wr"]], axis=1)   # [F_in, 4F]
    b_x = jnp.concatenate(
        [params["bq"], params["bk"], params["bv"], params["br"]], axis=1)   # [1, 4F]

    # Pre-folded sentence projection: SE @ ws + bs  -> [G, F].
    sent_proj = (sentence_embeddings.astype(jnp.float32) @ params["ws"]
                 + params["bs"])                                             # [G, F]

    # Block-diagonal head selector with 1/(3*sqrt(d_k)) folded in: [F, F].
    h_ids = np.arange(F) // D_K
    bd = jnp.asarray(
        (h_ids[:, None] == h_ids[None, :]).astype(np.float32)
        * np.float32(1.0 / (3.0 * np.sqrt(D_K))))                           # [F, F]

    args = (
        x.astype(jnp.float32), ec, row_t, grp, sent_proj,
        w_x, b_x, params["wo"], params["bo"], bd,
    )
    vmem = pl.BlockSpec(memory_space=pltpu.MemorySpace.VMEM)
    return pl.pallas_call(
        _graph_transformer_kernel,
        out_shape=jax.ShapeDtypeStruct((N, F), jnp.float32),
        in_specs=[vmem] * len(args),
        out_specs=vmem,
        compiler_params=pltpu.CompilerParams(
            vmem_limit_bytes=32 * 1024 * 1024),
    )(*args)


def init_params(key):
    ks = jax.random.split(key, 12)
    def w(k, shape, scale):
        return (jax.random.normal(k, shape, jnp.float32) * scale)
    p = {
        "wq": w(ks[0], (IN_CHANNELS, OUT_CHANNELS), 0.1),
        "bq": w(ks[1], (1, OUT_CHANNELS), 0.1),
        "wk": w(ks[2], (IN_CHANNELS, OUT_CHANNELS), 0.1),
        "bk": w(ks[3], (1, OUT_CHANNELS), 0.1),
        "wv": w(ks[4], (IN_CHANNELS, OUT_CHANNELS), 0.1),
        "bv": w(ks[5], (1, OUT_CHANNELS), 0.1),
        "ws": w(ks[6], (TOKEN_DIM, OUT_CHANNELS), 0.1),
        "bs": w(ks[7], (1, OUT_CHANNELS), 0.1),
        "wo": w(ks[8], (OUT_CHANNELS, OUT_CHANNELS), 0.1),
        "bo": w(ks[9], (1, OUT_CHANNELS), 0.1),
        # in_channels != out_channels -> residual_lin exists
        "wr": w(ks[10], (IN_CHANNELS, OUT_CHANNELS), 0.1),
        "br": w(ks[11], (1, OUT_CHANNELS), 0.1),
    }
    return p


def reference_forward(x, edge_index, sentence_embeddings, batch, p):
    # Pure numpy reference mirroring the PyTorch forward.
    x = np.asarray(x, np.float32)
    se = np.asarray(sentence_embeddings, np.float32)
    pn = {k: np.asarray(v, np.float32) for k, v in p.items()}
    H, C = HEADS, D_K
    grp = np.asarray(batch) // OPTION_NUM
    Q = (x @ pn["wq"] + pn["bq"][0]).reshape(-1, H, C)
    K = (x @ pn["wk"] + pn["bk"][0]).reshape(-1, H, C)
    V = (x @ pn["wv"] + pn["bv"][0]).reshape(-1, H, C)
    sent = se[grp]
    QS = (sent @ pn["ws"] + pn["bs"][0]).reshape(-1, H, C)
    row, col = np.asarray(edge_index)
    Q_i, K_j, V_j = Q[row], K[col], V[col]
    QS_i, KS_j = QS[row], QS[col]
    sqdk = np.sqrt(np.float32(C))
    a_qk = (Q_i * K_j).sum(-1) / sqdk
    a_qs_k = (QS_i * K_j).sum(-1) / sqdk
    a_q_ks = (Q_i * KS_j).sum(-1) / sqdk
    a = (a_qk + a_qs_k + a_q_ks) / 3.0
    a = np.where(a > 0, a, 0.2 * a)
    a = np.exp(a - a.max(axis=0, keepdims=True))
    a = a / a.sum(axis=0, keepdims=True)
    out = np.zeros_like(V)
    np.add.at(out, row, V_j * a[..., None])
    out = out.reshape(-1, H * C) @ pn["wo"] + pn["bo"][0]
    res = x @ pn["wr"] + pn["br"][0]
    return out + res


if __name__ == "__main__":
    key = jax.random.PRNGKey(0)
    k_p, k_x, k_s, k_e = jax.random.split(key, 4)

    N = 16        # nodes
    E = 24        # edges
    NUM_GRAPHS = 8
    G = NUM_GRAPHS // OPTION_NUM   # sentence groups

    params = init_params(k_p)
    x = jax.random.normal(k_x, (N, IN_CHANNELS), jnp.float32)
    sentence_embeddings = jax.random.normal(k_s, (G, TOKEN_DIM), jnp.float32)
    batch = jnp.arange(N, dtype=jnp.int32) // (N // NUM_GRAPHS)   # node -> graph id
    edge_index = jax.random.randint(k_e, (2, E), 0, N, dtype=jnp.int32)

    out = graph_transformer_layer(x, edge_index, sentence_embeddings, batch, params)
    out = jax.block_until_ready(out)

    ref = reference_forward(np.asarray(x), np.asarray(edge_index),
                            np.asarray(sentence_embeddings), np.asarray(batch), params)
    np.testing.assert_allclose(np.asarray(out), ref, rtol=1e-3, atol=1e-3)

    print("KERNEL_OK")
</pallas_src>

<mosaic_0001>
module attributes {stable_mosaic.version = 11 : i64} {
  func.func @_graph_transformer_kernel(%arg0: memref<16x16xf32, #tpu.memory_space<vmem>>, %arg1: memref<24x2xi32, #tpu.memory_space<vmem>>, %arg2: memref<1x24xi32, #tpu.memory_space<vmem>>, %arg3: memref<16x1xi32, #tpu.memory_space<vmem>>, %arg4: memref<2x32xf32, #tpu.memory_space<vmem>>, %arg5: memref<16x128xf32, #tpu.memory_space<vmem>>, %arg6: memref<1x128xf32, #tpu.memory_space<vmem>>, %arg7: memref<32x32xf32, #tpu.memory_space<vmem>>, %arg8: memref<1x32xf32, #tpu.memory_space<vmem>>, %arg9: memref<32x32xf32, #tpu.memory_space<vmem>>, %arg10: memref<16x32xf32, #tpu.memory_space<vmem>>) attributes {dimension_semantics = [], scalar_prefetch = 0 : i64, scratch_operands = 0 : i64, tpu.core_type = #tpu.core_type<tc>} {
    %c0 = arith.constant 0 : index
    %c0_0 = arith.constant 0 : index
    %0 = vector.load %arg0[%c0, %c0_0] : memref<16x16xf32, #tpu.memory_space<vmem>>, vector<16x16xf32>
    %c0_1 = arith.constant 0 : index
    %c0_2 = arith.constant 0 : index
    %1 = vector.load %arg5[%c0_1, %c0_2] : memref<16x128xf32, #tpu.memory_space<vmem>>, vector<16x128xf32>
    %cst = arith.constant dense<0.000000e+00> : vector<16x128xf32>
    %2 = tpu.matmul %0, %1, %cst {dimension_numbers = #tpu.dot_dimension_numbers<[1], [0], [0], [1], [0, 0, 1, 1], [], []>} : vector<16x16xf32>, vector<16x128xf32>, vector<16x128xf32> -> vector<16x128xf32>
    %c0_3 = arith.constant 0 : index
    %c0_4 = arith.constant 0 : index
    %3 = vector.load %arg6[%c0_3, %c0_4] : memref<1x128xf32, #tpu.memory_space<vmem>>, vector<1x128xf32>
    %4 = vector.broadcast %3 : vector<1x128xf32> to vector<16x128xf32>
    %5 = arith.addf %2, %4 : vector<16x128xf32>
    %6 = vector.extract_strided_slice %5 {offsets = [0, 96], sizes = [16, 32], strides = [1, 1]} : vector<16x128xf32> to vector<16x32xf32>
    %c0_5 = arith.constant 0 : index
    %c0_6 = arith.constant 0 : index
    %7 = vector.load %arg3[%c0_5, %c0_6] : memref<16x1xi32, #tpu.memory_space<vmem>>, vector<16x1xi32>
    %8 = tpu.iota {dimensions = array<i32: 1>} : vector<16x2xi32>
    %9 = vector.broadcast %7 : vector<16x1xi32> to vector<16x2xi32>
    %10 = arith.cmpi eq, %9, %8 : vector<16x2xi32>
    %11 = arith.extui %10 : vector<16x2xi1> to vector<16x2xi32>
    %12 = arith.sitofp %11 : vector<16x2xi32> to vector<16x2xf32>
    %c0_7 = arith.constant 0 : index
    %c0_8 = arith.constant 0 : index
    %13 = vector.load %arg4[%c0_7, %c0_8] : memref<2x32xf32, #tpu.memory_space<vmem>>, vector<2x32xf32>
    %cst_9 = arith.constant dense<0.000000e+00> : vector<16x32xf32>
    %14 = tpu.matmul %12, %13, %cst_9 {dimension_numbers = #tpu.dot_dimension_numbers<[1], [0], [0], [1], [0, 0, 1, 1], [], []>} : vector<16x2xf32>, vector<2x32xf32>, vector<16x32xf32> -> vector<16x32xf32>
    %15 = vector.extract_strided_slice %5 {offsets = [0, 0], sizes = [16, 96], strides = [1, 1]} : vector<16x128xf32> to vector<16x96xf32>
    %16 = tpu.concatenate %15, %14 in 1 : vector<16x96xf32>, vector<16x32xf32> -> vector<16x128xf32>
    %c0_10 = arith.constant 0 : index
    %c0_11 = arith.constant 0 : index
    %17 = vector.load %arg1[%c0_10, %c0_11] : memref<24x2xi32, #tpu.memory_space<vmem>>, vector<24x2xi32>
    %18 = vector.extract_strided_slice %17 {offsets = [0, 0], sizes = [24, 1], strides = [1, 1]} : vector<24x2xi32> to vector<24x1xi32>
    %19 = vector.extract_strided_slice %17 {offsets = [0, 1], sizes = [24, 1], strides = [1, 1]} : vector<24x2xi32> to vector<24x1xi32>
    %20 = tpu.iota {dimensions = array<i32: 1>} : vector<24x16xi32>
    %21 = vector.broadcast %18 : vector<24x1xi32> to vector<24x16xi32>
    %22 = arith.cmpi eq, %21, %20 : vector<24x16xi32>
    %23 = arith.extui %22 : vector<24x16xi1> to vector<24x16xi32>
    %24 = arith.sitofp %23 : vector<24x16xi32> to vector<24x16xf32>
    %25 = vector.broadcast %19 : vector<24x1xi32> to vector<24x16xi32>
    %26 = arith.cmpi eq, %25, %20 : vector<24x16xi32>
    %27 = arith.extui %26 : vector<24x16xi1> to vector<24x16xi32>
    %28 = arith.sitofp %27 : vector<24x16xi32> to vector<24x16xf32>
    %cst_12 = arith.constant dense<0.000000e+00> : vector<24x128xf32>
    %29 = tpu.matmul %24, %16, %cst_12 {dimension_numbers = #tpu.dot_dimension_numbers<[1], [0], [0], [1], [0, 0, 1, 1], [], []>} : vector<24x16xf32>, vector<16x128xf32>, vector<24x128xf32> -> vector<24x128xf32>
    %cst_13 = arith.constant dense<0.000000e+00> : vector<24x128xf32>
    %30 = tpu.matmul %28, %16, %cst_13 {dimension_numbers = #tpu.dot_dimension_numbers<[1], [0], [0], [1], [0, 0, 1, 1], [], []>} : vector<24x16xf32>, vector<16x128xf32>, vector<24x128xf32> -> vector<24x128xf32>
    %31 = vector.extract_strided_slice %29 {offsets = [0, 0], sizes = [24, 32], strides = [1, 1]} : vector<24x128xf32> to vector<24x32xf32>
    %32 = vector.extract_strided_slice %29 {offsets = [0, 96], sizes = [24, 32], strides = [1, 1]} : vector<24x128xf32> to vector<24x32xf32>
    %33 = vector.extract_strided_slice %30 {offsets = [0, 32], sizes = [24, 32], strides = [1, 1]} : vector<24x128xf32> to vector<24x32xf32>
    %34 = vector.extract_strided_slice %30 {offsets = [0, 64], sizes = [24, 32], strides = [1, 1]} : vector<24x128xf32> to vector<24x32xf32>
    %35 = vector.extract_strided_slice %30 {offsets = [0, 96], sizes = [24, 32], strides = [1, 1]} : vector<24x128xf32> to vector<24x32xf32>
    %36 = arith.addf %33, %35 : vector<24x32xf32>
    %37 = arith.mulf %31, %36 : vector<24x32xf32>
    %38 = arith.mulf %32, %33 : vector<24x32xf32>
    %39 = arith.addf %37, %38 : vector<24x32xf32>
    %c0_14 = arith.constant 0 : index
    %c0_15 = arith.constant 0 : index
    %40 = vector.load %arg9[%c0_14, %c0_15] : memref<32x32xf32, #tpu.memory_space<vmem>>, vector<32x32xf32>
    %cst_16 = arith.constant dense<0.000000e+00> : vector<24x32xf32>
    %41 = tpu.matmul %39, %40, %cst_16 {dimension_numbers = #tpu.dot_dimension_numbers<[1], [0], [0], [1], [0, 0, 1, 1], [], []>} : vector<24x32xf32>, vector<32x32xf32>, vector<24x32xf32> -> vector<24x32xf32>
    %cst_17 = arith.constant 0.000000e+00 : f32
    %42 = vector.broadcast %cst_17 : f32 to vector<24x32xf32>
    %43 = arith.cmpf ogt, %41, %42 : vector<24x32xf32>
    %cst_18 = arith.constant 2.000000e-01 : f32
    %44 = vector.broadcast %cst_18 : f32 to vector<24x32xf32>
    %45 = arith.mulf %44, %41 : vector<24x32xf32>
    %46 = arith.select %43, %41, %45 : vector<24x32xi1>, vector<24x32xf32>
    %cst_19 = arith.constant dense<0xFF800000> : vector<32xf32>
    %47 = vector.multi_reduction <maximumf>, %46, %cst_19 [0] : vector<24x32xf32> to vector<32xf32>
    %48 = vector.shape_cast %47 : vector<32xf32> to vector<1x32xf32>
    %49 = vector.broadcast %48 : vector<1x32xf32> to vector<24x32xf32>
    %50 = arith.subf %46, %49 : vector<24x32xf32>
    %51 = math.exp %50 : vector<24x32xf32>
    %cst_20 = arith.constant dense<0.000000e+00> : vector<32xf32>
    %52 = vector.multi_reduction <add>, %51, %cst_20 [0] : vector<24x32xf32> to vector<32xf32>
    %53 = vector.shape_cast %52 : vector<32xf32> to vector<1x32xf32>
    %54 = vector.broadcast %53 : vector<1x32xf32> to vector<24x32xf32>
    %55 = arith.divf %51, %54 : vector<24x32xf32>
    %56 = arith.mulf %34, %55 : vector<24x32xf32>
    %c0_21 = arith.constant 0 : index
    %c0_22 = arith.constant 0 : index
    %57 = vector.load %arg2[%c0_21, %c0_22] : memref<1x24xi32, #tpu.memory_space<vmem>>, vector<1x24xi32>
    %58 = tpu.iota {dimensions = array<i32: 0>} : vector<16x24xi32>
    %59 = vector.broadcast %57 : vector<1x24xi32> to vector<16x24xi32>
    %60 = arith.cmpi eq, %59, %58 : vector<16x24xi32>
    %61 = arith.extui %60 : vector<16x24xi1> to vector<16x24xi32>
    %62 = arith.sitofp %61 : vector<16x24xi32> to vector<16x24xf32>
    %cst_23 = arith.constant dense<0.000000e+00> : vector<16x32xf32>
    %63 = tpu.matmul %62, %56, %cst_23 {dimension_numbers = #tpu.dot_dimension_numbers<[1], [0], [0], [1], [0, 0, 1, 1], [], []>} : vector<16x24xf32>, vector<24x32xf32>, vector<16x32xf32> -> vector<16x32xf32>
    %c0_24 = arith.constant 0 : index
    %c0_25 = arith.constant 0 : index
    %64 = vector.load %arg7[%c0_24, %c0_25] : memref<32x32xf32, #tpu.memory_space<vmem>>, vector<32x32xf32>
    %cst_26 = arith.constant dense<0.000000e+00> : vector<16x32xf32>
    %65 = tpu.matmul %63, %64, %cst_26 {dimension_numbers = #tpu.dot_dimension_numbers<[1], [0], [0], [1], [0, 0, 1, 1], [], []>} : vector<16x32xf32>, vector<32x32xf32>, vector<16x32xf32> -> vector<16x32xf32>
    %c0_27 = arith.constant 0 : index
    %c0_28 = arith.constant 0 : index
    %66 = vector.load %arg8[%c0_27, %c0_28] : memref<1x32xf32, #tpu.memory_space<vmem>>, vector<1x32xf32>
    %67 = vector.broadcast %66 : vector<1x32xf32> to vector<16x32xf32>
    %68 = arith.addf %65, %67 : vector<16x32xf32>
    %69 = arith.addf %68, %6 : vector<16x32xf32>
    %c0_29 = arith.constant 0 : index
    %c0_30 = arith.constant 0 : index
    %70 = vector.load %arg10[%c0_29, %c0_30] : memref<16x32xf32, #tpu.memory_space<vmem>>, vector<16x32xf32>
    tpu.vector_store %arg10[%c0_29, %c0_30], %69 {strides = array<i32>} : memref<16x32xf32, #tpu.memory_space<vmem>>, vector<16x32xf32>,
    return
  }
}

</mosaic_0001>

<bundles_post_ra>
// kernel: tpu_custom_call.1
= control target key start
LH: loop header
LB: loop body
LE: loop exit
PB: predicated region body
PF: predicated region fallthrough
CT: control target
= control target key end

     0   :  { %15 = vsyncpa [#allocation3], 0  ;;  %s1568_s0 = inlined_call_operand.hbm [shape: f32[16,16], index: 0, kind: input, shape index: {}]   ;;  %s1569_s1 = inlined_call_operand.vmem [shape: s32[24,2], index: 1, kind: input, shape index: {}]   ;;  %s1570_s2 = inlined_call_operand.vmem [shape: s32[1,24], index: 2, kind: input, shape index: {}]   ;;  %s1571_s3 = inlined_call_operand.vmem [shape: s32[16,1], index: 3, kind: input, shape index: {}]   ;;  %s1572_s4 = inlined_call_operand.hbm [shape: f32[2,32], index: 4, kind: input, shape index: {}]   ;;  %s1573_s5 = inlined_call_operand.hbm [shape: f32[16,128], index: 5, kind: input, shape index: {}]   ;;  %s1574_s6 = inlined_call_operand.hbm [shape: f32[1,128], index: 6, kind: input, shape index: {}]   ;;  %s1575_s7 = inlined_call_operand.vmem [shape: f32[32,32], index: 7, kind: input, shape index: {}]   ;;  %s1576_s8 = inlined_call_operand.vmem [shape: f32[1,32], index: 8, kind: input, shape index: {}]   ;;  %s1577_s9 = inlined_call_operand.vmem [shape: f32[32,32], index: 9, kind: input, shape index: {}]   ;;  %s1578_s10 = inlined_call_operand.hbm [shape: f32[16,32], index: 10, kind: output, shape index: {}]  }
   0x1   :  { %16 = vsyncpa [#allocation6], 0 }
   0x2   :  { %17 = vsyncpa [#allocation9], 0 }
   0x3   :  { %18 = vsyncpa [#allocation4], 0  ;;  %s1269_s13 = smov [#allocation5]   ;;  %s1270_s15 = smov [#allocation2]  }
   0x4   :  { %s43_s14 = sshll.u32 %s1269_s13, 4  ;;  %s24_s16 = sshll.u32 %s1270_s15, 4  ;;  %s44_s14 = int_to_ptr.vmem [resolvable:$true] %s43_s14  ;;  %s1339_s16 = int_to_ptr.vmem [resolvable:$true] %s24_s16 }
   0x5   :  { %s1151_s19 = scalar_lea.hbm %s1572_s4, 32 }
   0x6   :  { %p1152_p0 = scmp.ne.s32.totalorder %s1572_s4, %s1151_s19  ;;  %p1155_p1 = scmp.lt.u32.totalorder %s1151_s19, %s1572_s4 }
   0x8   :  { %p1157_p2 = pnand %p1155_p1, %p1152_p0 }
   0xa   :  { %1160 = shalt.err (!%p1157_p2)
}
   0xb   :  { %s1161_s24 = scalar_lea.vmem %s44_s14, 32  ;;  %p1166_p4 = scmp.lt.s32.totalorder %s44_s14, %s44_s14 }
   0xc   :  { %p1162_p3 = scmp.ne.s32.totalorder %s44_s14, %s1161_s24  ;;  %p1167_p5 = scmp.lt.s32.totalorder %s1161_s24, %s1161_s24 }
   0xe   :  { %p1168_p6 = por %p1167_p5, %p1166_p4 }
  0x10   :  { %p1169_p7 = pnand %p1168_p6, %p1162_p3 }
  0x12   :  { %1172 = shalt.err (!%p1169_p7)
}
  0x13   :  { %46 = dma.hbm_to_vmem [thread:$0]  %s1572_s4, 32, %s44_s14, [#allocation6]  }
  0x14   :  { %s1173_s29 = scalar_lea.hbm %s1568_s0, 256 }
  0x15   :  { %p1174_p8 = scmp.ne.s32.totalorder %s1568_s0, %s1173_s29  ;;  %p1177_p9 = scmp.lt.u32.totalorder %s1173_s29, %s1568_s0 }
  0x17   :  { %p1179_p10 = pnand %p1177_p9, %p1174_p8 }
  0x19   :  { %1182 = shalt.err (!%p1179_p10)
}
  0x1a   :  { %s1183_s15 = scalar_lea.vmem %s1339_s16, 256  ;;  %p1188_p12 = scmp.lt.s32.totalorder %s1339_s16, %s1339_s16 }
  0x1b   :  { %p1184_p11 = scmp.ne.s32.totalorder %s1339_s16, %s1183_s15  ;;  %p1189_p13 = scmp.lt.s32.totalorder %s1183_s15, %s1183_s15 }
  0x1d   :  { %p1190_p0 = por %p1189_p13, %p1188_p12 }
  0x1f   :  { %p1191_p1 = pnand %p1190_p0, %p1184_p11 }
  0x21   :  { %1194 = shalt.err (!%p1191_p1)
}
  0x22   :  { %s1271_s4 = smov 128   ;;  %s1272_s14 = smov 8  }
  0x23   :  { %30 = dma.hbm_to_vmem [thread:$0]  %s1568_s0, 256, %s1339_s16, [#allocation3], %s1271_s4, %s1271_s4, %s1272_s14  }
  0x24   :  { %s1273_s19 = smov [#allocation7]   ;;  %s1274_s21 = smov [#allocation8]  }
  0x25   :  { %s52_s20 = sshll.u32 %s1273_s19, 4  ;;  %s65_s22 = sshll.u32 %s1274_s21, 4  ;;  %s53_s20 = int_to_ptr.vmem [resolvable:$true] %s52_s20  ;;  %s66_s22 = int_to_ptr.vmem [resolvable:$true] %s65_s22 }
  0x26   :  { %s1195_s25 = scalar_lea.hbm %s1573_s5, 256 }
  0x27   :  { %p1196_p2 = scmp.ne.s32.totalorder %s1573_s5, %s1195_s25  ;;  %p1199_p3 = scmp.lt.u32.totalorder %s1195_s25, %s1573_s5 }
  0x29   :  { %p1201_p4 = pnand %p1199_p3, %p1196_p2 }
  0x2b   :  { %1204 = shalt.err (!%p1201_p4)
}
  0x2c   :  { %s1205_s0 = scalar_lea.vmem %s53_s20, 256  ;;  %p1210_p6 = scmp.lt.s32.totalorder %s53_s20, %s53_s20 }
  0x2d   :  { %p1206_p5 = scmp.ne.s32.totalorder %s53_s20, %s1205_s0  ;;  %p1211_p7 = scmp.lt.s32.totalorder %s1205_s0, %s1205_s0 }
  0x2f   :  { %p1212_p8 = por %p1211_p7, %p1210_p6 }
  0x31   :  { %p1213_p9 = pnand %p1212_p8, %p1206_p5 }
  0x33   :  { %1216 = shalt.err (!%p1213_p9)
}
  0x34   :  { %58 = dma.hbm_to_vmem [thread:$0]  %s1573_s5, 256, %s53_s20, [#allocation6], %s1271_s4, %s1271_s4, %s1272_s14  }
  0x35   :  { %s1217_s13 = scalar_lea.hbm %s1574_s6, 16 }
  0x36   :  { %p1218_p10 = scmp.ne.s32.totalorder %s1574_s6, %s1217_s13  ;;  %p1221_p11 = scmp.lt.u32.totalorder %s1217_s13, %s1574_s6 }
  0x38   :  { %p1223_p12 = pnand %p1221_p11, %p1218_p10 }
  0x3a   :  { %1226 = shalt.err (!%p1223_p12)
}
  0x3b   :  { %s1227_s21 = scalar_lea.vmem %s66_s22, 16  ;;  %s1231_s23 = scalar_lea.vmem %s66_s22, 32 }
  0x3c   :  { %p1228_p13 = scmp.ne.s32.totalorder %s66_s22, %s1227_s21  ;;  %p1232_p0 = scmp.lt.s32.totalorder %s66_s22, %s66_s22 }
  0x3d   :  { %p1233_p1 = scmp.lt.s32.totalorder %s1231_s23, %s1227_s21 }
  0x3f   :  { %p1234_p2 = por %p1233_p1, %p1232_p0 }
  0x41   :  { %p1235_p3 = pnand %p1234_p2, %p1228_p13 }
  0x43   :  { %1238 = shalt.err (!%p1235_p3)
}
  0x44   :  { %68 = dma.hbm_to_vmem [thread:$0]  %s1574_s6, 16, %s66_s22, [#allocation9]  }
  0x45   :  { %1261 = dma.done.wait [#allocation3], 256  }
  0x46   :  { %1262 = vsyncadd [#allocation3], 4294967040 }
  0x47   :  { %1263 = dma.done.wait [#allocation6], 288  }
  0x48   :  { %1264 = vsyncadd [#allocation6], 4294967008 }
  0x49   :  { %1265 = dma.done.wait [#allocation9], 16  }
  0x4a   :  { %1266 = vsyncadd [#allocation9], 4294967280  ;;  %v1275_v0 = vmov 0   ;;  %v180_v1 = vld [vmem:[%s1571_s3] sm:$0xff]  ;;  %v181_v2 = vld [vmem:[%s1571_s3 + $0x8] sm:$0xff]  ;;  %vm204_vm0 = vcmask 1041408   ;;  %v182_v11 = vlaneseq }
  0x4b   :  { %1127 = vset.pattern.permute.xlu0 %v1275_v0  ;;  %v196_v3 = vld [vmem:[#allocation5] sm:$0x3]  ;;  %v89_v4 = vld [vmem:[#allocation7] sm:$0xff]  ;;  %v90_v5 = vld [vmem:[#allocation7 + $0x8] sm:$0xff]  ;;  %vm98_vm1 = vcmask 130048   ;;  %v1276_v8 = vmov 1  }
  0x4c   :  { %185 = vperm.xlu0 %1127, %v180_v1   ;;  %1016 = vmatprep.subr.msk.mxu1 %vm204_vm0, %v196_v3  ;;  %v87_v6 = vld [vmem:[#allocation2] sm:$0xff]  ;;  %v1084_v7 = vpack.c.bf16 %v90_v5, %v89_v4  ;;  %v88_v10 = vld [vmem:[#allocation2 + $0x8] sm:$0xff]  ;;  %v1412_v12 = vand.u32 127, %v182_v11  ;;  %vm197_vm2 = vcmask 15360   ;;  %v1277_v14 = vmov 0.0   ;;  %s1280_s29 = smov 96  }
  0x4d   :  { %1017 = vmatpush3.msk.msra.mxu1 %vm204_vm0, %v196_v3  ;;  %1013 = vmatprep.mubr.msk.f32.mxu0 %vm98_vm1, %v87_v6  ;;  %v294_v9 = vld [vmem:[%s1569_s1] sm:$0xff]  ;;  %v295_v18 = vld [vmem:[%s1569_s1 + $0x8] sm:$0xff]  ;;  %v1278_v21 = vmov 0.0|0.0   ;;  %vm1279_vm5 = vmmov 0   ;;  %v296_v25 = vld [vmem:[%s1569_s1 + $0x10] sm:$0xff]  ;;  %vm291_vm6 = vcmask 785408  }
  0x4e   :  { %1128 = vset.pattern.permute.xlu1 %v1276_v8  ;;  %1085 = vmatprep.subr.bf16.mxu0 %v1084_v7  ;;  %v943_v27 = vld [vmem:[#allocation8] ss:$0 sm:$0xff]  ;;  %s1281_s1 = smov 64   ;;  %v560_v50 = vld [vmem:[%s1577_s9 + $0x8] sm:$0xff]  ;;  %v561_v62 = vld [vmem:[%s1577_s9 + $0x10] sm:$0xff]  ;;  %s1282_s21 = smov 32  }
  0x4f   :  { %316 = vperm.xlu1 %1128, %v294_v9   ;;  %1087 = vmatpush3.bf16.msra.mxu0 %v1084_v7  ;;  %v559_v49 = vld [vmem:[%s1577_s9] sm:$0xff]  ;;  %v562_v63 = vld [vmem:[%s1577_s9 + $0x18] sm:$0xff]  ;;  %vm563_vm13 = vcmask 261120   ;;  %s1283_s3 = smov [#allocation10]  }
  0x50   :  { %188 = vperm.xlu0 %1127, %v181_v2   ;;  %1088 = vmatprep.subr.bf16.mxu1 %v1278_v21  ;;  %v1095_v51 = vpack.c.bf16 %v560_v50, %v559_v49  ;;  %s929_s28 = sshll.u32 %s1283_s3, 4  ;;  %s930_s28 = int_to_ptr.vmem [resolvable:$true] %s929_s28 }
  0x51   :  { %1091 = vmatprep.subr.bf16.mxu0 %v1278_v21  ;;  %p1244_p5 = scmp.lt.s32.totalorder %s930_s28, %s930_s28 }
  0x52   :  { %1014 = vmatmul.mubr.msk.f32.vlgmr.msra.gmra.mrb[0].mxu0 %vm98_vm1, %v88_v10 }
  0x53   :  { %1038 = vmatprep.mubr.msk.f32.mxu0 %vm1279_vm5, %v1277_v14 }
  0x54   :  { %1134 = vset.pattern.permute.xlu0 %v1276_v8 }
  0x55   :  { %319 = vperm.xlu0 %1134, %v295_v18  }
  0x59   :  { %1136 = vset.pattern.permute.xlu0 %v1275_v0 }
  0x5a   :  { %301 = vperm.xlu0 %1136, %v295_v18  }
  0x5e   :  { %1142 = vset.pattern.permute.xlu0 %v1276_v8 }
  0xcb   :  { %v186_v13 = vpop.permute.xlu0 %185 }
  0xcc   :  { %vm190_vm3 = vcmp.eq.s32.totalorder %v186_v13, %v1412_v12 }
  0xcd   :  { %v946_v15 = vsel %vm190_vm3, 1.0, %v1277_v14  ;;  %vm738_vm3 = vcmask 195584  }
  0xce   :  { %1018 = vmatprep.mubr.msk.f32.mxu1 %vm197_vm2, %v946_v15  ;;  %v317_v26 = vpop.permute.xlu1 %316 }
  0xcf   :  { %v189_v16 = vpop.permute.xlu0 %188  ;;  %vm324_vm7 = vcmp.eq.s32.totalorder %v317_v26, %v1412_v12 }
  0xd0   :  { %vm191_vm4 = vcmp.eq.s32.totalorder %v189_v16, %v1412_v12  ;;  %v954_v37 = vsel %vm324_vm7, 1.0, %v1277_v14 }
  0xd1   :  { %v947_v17 = vsel %vm191_vm4, 1.0, %v1277_v14 }
  0xd2   :  { %1019 = vmatmul.mubr.msk.f32.vlgmr.msra.gmra.mrb[0].mxu1 %vm197_vm2, %v947_v17 }
  0xd3   :  { %1025 = vmatprep.mubr.msk.f32.mxu1 %vm1279_vm5, %v1277_v14 }
  0xd4   :  { %v320_v36 = vpop.permute.xlu0 %319 }
  0xd5   :  { %vm325_vm8 = vcmp.eq.s32.totalorder %v320_v36, %v1412_v12 }
  0xd6   :  { %v955_v38 = vsel %vm325_vm8, 1.0, %v1277_v14 }
  0xd9   :  { %v302_v41 = vpop.permute.xlu0 %301 }
  0xda   :  { %vm307_vm11 = vcmp.eq.s32.totalorder %v302_v41, %v1412_v12 }
  0xdb   :  { %v952_v44 = vsel %vm307_vm11, 1.0, %v1277_v14 }
 0x125   :  { %v1015_v19 = vpop.f32.mrb[0].mxu0 }
 0x126   :  { %v171_v20 = vpop.f32.mrb[1].mxu0  ;;  %v1431_v28 = vadd.f32 %v1015_v19, %v943_v27 }
 0x127   :  { %v1433_v29 = vadd.f32 %v943_v27, %v171_v20 }
 0x1a5   :  { %v1020_v22 = vpop.f32.mrb[0].mxu1 }
 0x1a6   :  { %v274_v23 = vpop.f32.mrb[1].mxu1 }
 0x1a7   :  { %v1129_v24 = vpack.i.bf16 %v1020_v22, %v274_v23 }
 0x1a9   :  { %1130 = vrot.lane.b32.xlu1 %v1129_v24, %s1280_s29 }
 0x1ad   :  { %322 = vperm.xlu1 %1128, %v296_v25  }
 0x1b1   :  { %1135 = vset.pattern.permute.xlu1 %v1275_v0  ;;  %v1098_v0 = vpack.c.bf16 %v562_v63, %v561_v62 }
 0x1b2   :  { %298 = vperm.xlu1 %1135, %v294_v9  }
 0x1b6   :  { %304 = vperm.xlu1 %1135, %v296_v25  }
 0x21b   :  { %v1131_v30 = vpop.permute.xlu1 %1130 }
 0x21c   :  { %v1133_v31 = vunpack.i.h.bf16 %v1131_v30  ;;  %v1132_v32 = vunpack.i.l.bf16 %v1131_v30 }
 0x21e   :  { %v293_v33 = vsel %vm291_vm6, %v1431_v28, %v1133_v31  ;;  %v292_v34 = vsel %vm291_vm6, %v1433_v29, %v1132_v32 }
 0x21f   :  { %v1089_v35 = vpack.c.bf16 %v293_v33, %v292_v34 }
 0x221   :  { %1090 = vmatpush3.bf16.msra.mxu1 %v1089_v35  ;;  %1093 = vmatpush3.bf16.msra.mxu0 %v1089_v35 }
 0x222   :  { %1094 = vmatprep.subr.bf16.mxu1 %v1278_v21 }
 0x224   :  { %1039 = vmatmul.mubr.msk.f32.vlgmr.msra.gmra.mrb[2].mxu0 %vm98_vm1, %v954_v37 }
 0x225   :  { %1041 = vmatprep.mubr.msk.f32.mxu0 %vm1279_vm5, %v1277_v14 }
 0x228   :  { %1042 = vmatmul.mubr.msk.f32.gmra.mrb[4].mxu0 %vm98_vm1, %v955_v38 }
 0x229   :  { %1044 = vmatprep.mubr.msk.f32.mxu0 %vm1279_vm5, %v1277_v14 }
 0x22c   :  { %v323_v39 = vpop.permute.xlu1 %322 }
 0x22d   :  { %vm326_vm9 = vcmp.eq.s32.totalorder %v323_v39, %v1412_v12 }
 0x22e   :  { %v956_v40 = vsel %vm326_vm9, 1.0, %v1277_v14 }
 0x22f   :  { %1045 = vmatmul.mubr.msk.f32.gmra.mrb[6].mxu0 %vm98_vm1, %v956_v40 }
 0x231   :  { %v299_v42 = vpop.permute.xlu1 %298 }
 0x232   :  { %vm306_vm10 = vcmp.eq.s32.totalorder %v299_v42, %v1412_v12 }
 0x233   :  { %v951_v43 = vsel %vm306_vm10, 1.0, %v1277_v14 }
 0x234   :  { %1026 = vmatmul.mubr.msk.f32.vlgmr.msra.gmra.mrb[2].mxu1 %vm98_vm1, %v951_v43 }
 0x235   :  { %1028 = vmatprep.mubr.msk.f32.mxu1 %vm1279_vm5, %v1277_v14  ;;  %v305_v45 = vpop.permute.xlu1 %304  ;;  %1096 = vmatpush3.bf16.msra.mxu1 %v1095_v51 }
 0x236   :  { %vm308_vm12 = vcmp.eq.s32.totalorder %v305_v45, %v1412_v12  ;;  %1097 = vmatprep.subr.bf16.mxu1 %v1278_v21 }
 0x237   :  { %v953_v46 = vsel %vm308_vm12, 1.0, %v1277_v14 }
 0x238   :  { %1029 = vmatmul.mubr.msk.f32.gmra.mrb[4].mxu1 %vm98_vm1, %v952_v44 }
 0x239   :  { %1031 = vmatprep.mubr.msk.f32.mxu1 %vm1279_vm5, %v1277_v14  ;;  %1099 = vmatpush3.bf16.msra.mxu1 %v1098_v0 }
 0x23c   :  { %1032 = vmatmul.mubr.msk.f32.gmra.mrb[6].mxu1 %vm98_vm1, %v953_v46 }
 0x23d   :  { %1055 = vmatprep.mubr.msk.f32.mxu1 %vm1279_vm5, %v1277_v14 }
 0x2f7   :  { %v1466_v47 = vpop.f32.mrb[2].mxu0 }
 0x2f8   :  { %514 = vrot.lane.b32.xlu1 %v1466_v47, %s1281_s1  ;;  %v1040_v48 = vpop.f32.mrb[3].mxu0 }
 0x2fb   :  { %v1476_v52 = vpop.f32.mrb[4].mxu0 }
 0x2fc   :  { %516 = vrot.lane.b32.xlu0 %v1476_v52, %s1281_s1  ;;  %v1043_v53 = vpop.f32.mrb[5].mxu0 }
 0x302   :  { %v1481_v54 = vpop.f32.mrb[6].mxu0 }
 0x303   :  { %518 = vrot.lane.b32.xlu1 %v1481_v54, %s1281_s1  ;;  %v1046_v55 = vpop.f32.mrb[7].mxu0 }
 0x307   :  { %v408_v56 = vpop.f32.mrb[2].mxu1 }
 0x308   :  { %v1027_v57 = vpop.f32.mrb[3].mxu1 }
 0x30b   :  { %v413_v58 = vpop.f32.mrb[4].mxu1 }
 0x30c   :  { %v1030_v59 = vpop.f32.mrb[5].mxu1 }
 0x30f   :  { %v418_v60 = vpop.f32.mrb[6].mxu1 }
 0x310   :  { %v1033_v61 = vpop.f32.mrb[7].mxu1 }
 0x36a   :  { %v515_v1 = vpop.permute.xlu1 %514 }
 0x36b   :  { %v523_v2 = vadd.f32 %v515_v1, %v1466_v47  ;;  %v541_v3 = vmul.f32 %v515_v1, %v408_v56 }
 0x36d   :  { %529 = vrot.lane.b32.xlu0 %v523_v2, %s1280_s29  ;;  %547 = vrot.lane.b32.xlu1 %v541_v3, %s1282_s21 }
 0x36e   :  { %v517_v4 = vpop.permute.xlu0 %516 }
 0x36f   :  { %v524_v5 = vadd.f32 %v517_v4, %v1476_v52  ;;  %v542_v6 = vmul.f32 %v517_v4, %v413_v58 }
 0x371   :  { %531 = vrot.lane.b32.xlu0 %v524_v5, %s1280_s29  ;;  %549 = vrot.lane.b32.xlu1 %v542_v6, %s1282_s21 }
 0x375   :  { %v519_v7 = vpop.permute.xlu1 %518 }
 0x376   :  { %v525_v8 = vadd.f32 %v519_v7, %v1481_v54  ;;  %v543_v9 = vmul.f32 %v519_v7, %v418_v60 }
 0x378   :  { %533 = vrot.lane.b32.xlu0 %v525_v8, %s1280_s29  ;;  %551 = vrot.lane.b32.xlu1 %v543_v9, %s1282_s21  ;;  %s1239_s29 = scalar_lea.vmem %s930_s28, 256 }
 0x379   :  { %p1240_p4 = scmp.ne.s32.totalorder %s930_s28, %s1239_s29  ;;  %p1245_p6 = scmp.lt.s32.totalorder %s1239_s29, %s1239_s29 }
 0x37b   :  { %p1246_p7 = por %p1245_p6, %p1244_p5 }
 0x37d   :  { %p1247_p8 = pnand %p1246_p7, %p1240_p4 }
 0x3df   :  { %v530_v10 = vpop.permute.xlu0 %529  ;;  %v548_v12 = vpop.permute.xlu1 %547 }
 0x3e0   :  { %v538_v13 = vmul.f32 %v530_v10, %v408_v56 }
 0x3e2   :  { %v556_v15 = vadd.f32 %v548_v12, %v538_v13  ;;  %v714_v13 = vshrl.u32 %v182_v11, 7 }
 0x3e3   :  { %v532_v16 = vpop.permute.xlu0 %531  ;;  %v550_v17 = vpop.permute.xlu1 %549 }
 0x3e4   :  { %v539_v18 = vmul.f32 %v532_v16, %v413_v58  ;;  %1056 = vmatmul.mubr.msk.f32.vlgmr.msra.gmra.mrb[8].mxu1 %vm563_vm13, %v556_v15  ;;  %v966_v15 = vld [vmem:[%s1570_s2] ss:$0 sm:$0xff]  ;;  %v715_v16 = vadd.s32 8, %v714_v13 }
 0x3e5   :  { %1058 = vmatprep.mubr.msk.f32.mxu1 %vm1279_vm5, %v1277_v14  ;;  %vm720_vm1 = vcmp.eq.s32.totalorder %v966_v15, %v714_v13 }
 0x3e6   :  { %v557_v19 = vadd.f32 %v550_v17, %v539_v18  ;;  %vm721_vm2 = vcmp.eq.s32.totalorder %v966_v15, %v715_v16 }
 0x3e8   :  { %1059 = vmatmul.mubr.msk.f32.gmra.mrb[10].mxu1 %vm563_vm13, %v557_v19 }
 0x3e9   :  { %1061 = vmatprep.mubr.msk.f32.mxu1 %vm1279_vm5, %v1277_v14 }
 0x3ea   :  { %v534_v20 = vpop.permute.xlu0 %533  ;;  %v552_v22 = vpop.permute.xlu1 %551 }
 0x3eb   :  { %v540_v21 = vmul.f32 %v534_v20, %v418_v60 }
 0x3ed   :  { %v558_v23 = vadd.f32 %v552_v22, %v540_v21  ;;  %v967_v21 = vsel %vm720_vm1, 1.0, %v1277_v14 }
 0x3ee   :  { %1070 = vmatprep.mubr.msk.f32.mxu0 %vm738_vm3, %v967_v21 }
 0x3ef   :  { %1062 = vmatmul.mubr.msk.f32.gmra.mrb[12].mxu1 %vm563_vm13, %v558_v23 }
 0x4b7   :  { %v639_v24 = vpop.f32.mrb[8].mxu1 }
 0x4b8   :  { %v656_v25 = vmul.f32 0.2, %v639_v24  ;;  %v1057_v26 = vpop.f32.mrb[9].mxu1  ;;  %vm653_vm14 = vcmp.gt.f32.partialorder %v639_v24, 0.0 }
 0x4b9   :  { %v820_v26 = vld [vmem:[%s1575_s7] sm:$0xff] }
 0x4ba   :  { %v659_v30 = vsel %vm653_vm14, %v639_v24, %v656_v25 }
 0x4bb   :  { %v644_v27 = vpop.f32.mrb[10].mxu1  ;;  %v662_v34 = vsel %vm563_vm13, %v659_v30, -inf }
 0x4bc   :  { %vm654_vm15 = vcmp.gt.f32.partialorder %v644_v27, 0.0  ;;  %v657_v31 = vmul.f32 0.2, %v644_v27  ;;  %v1060_v32 = vpop.f32.mrb[11].mxu1 }
 0x4be   :  { %v660_v33 = vsel %vm654_vm15, %v644_v27, %v657_v31  ;;  %v968_v31 = vsel %vm721_vm2, 1.0, %v1277_v14 }
 0x4bf   :  { %v663_v35 = vsel %vm563_vm13, %v660_v33, -inf }
 0x4c0   :  { %v665_v36 = vmax.f32 %v662_v34, %v663_v35  ;;  %v971_v35 = vld [vmem:[%s1576_s8] ss:$0 sm:$0xff] }
 0x4c2   :  { %v649_v37 = vpop.f32.mrb[12].mxu1 }
 0x4c3   :  { %vm655_vm0 = vcmp.gt.f32.partialorder %v649_v37, 0.0  ;;  %v658_v38 = vmul.f32 0.2, %v649_v37  ;;  %v1063_v39 = vpop.f32.mrb[13].mxu1 }
 0x4c5   :  { %v661_v40 = vsel %vm655_vm0, %v649_v37, %v658_v38 }
 0x4c6   :  { %v664_v41 = vsel %vm563_vm13, %v661_v40, -inf }
 0x4c7   :  { %v666_v42 = vmax.f32 %v665_v36, %v664_v41 }
 0x4c9   :  { %v667_v43 = vrot.slane %v666_v42, 4 }
 0x4cb   :  { %v668_v44 = vmax.f32 %v666_v42, %v667_v43 }
 0x4cd   :  { %v669_v45 = vrot.slane %v668_v44, 2 }
 0x4cf   :  { %v670_v46 = vmax.f32 %v668_v44, %v669_v45 }
 0x4d1   :  { %v671_v48 = vrot.slane %v670_v46, 1 }
 0x4d3   :  { %v672_v49 = vmax.f32 %v670_v46, %v671_v48 }
 0x4d5   :  { %v673_v50 = vsub.f32 %v659_v30, %v672_v49  ;;  %v674_v51 = vsub.f32 %v660_v33, %v672_v49  ;;  %v675_v53 = vsub.f32 %v661_v40, %v672_v49 }
 0x4d7   :  { %v676_v55 = vmul.f32 1.442695, %v673_v50  ;;  %v678_v56 = vmul.f32 1.442695, %v674_v51  ;;  %v680_v57 = vmul.f32 1.442695, %v675_v53 }
 0x4d9   :  { %1143 = vpow2.f32 %v676_v55 }
 0x4da   :  { %1145 = vpow2.f32 %v678_v56 }
 0x4db   :  { %1147 = vpow2.f32 %v680_v57 }
 0x4e3   :  { %v1144_v58 = vpop.eup %1143 }
 0x4e4   :  { %v1146_v59 = vpop.eup %1145  ;;  %v682_v60 = vsel %vm563_vm13, %v1144_v58, 0.0 }
 0x4e5   :  { %v1148_v61 = vpop.eup %1147  ;;  %v683_v62 = vsel %vm563_vm13, %v1146_v59, 0.0 }
 0x4e6   :  { %v684_v63 = vadd.f32 %v683_v62, %v682_v60  ;;  %v685_v0 = vsel %vm563_vm13, %v1148_v61, 0.0 }
 0x4e8   :  { %v686_v1 = vadd.f32 %v685_v0, %v684_v63 }
 0x4ea   :  { %v687_v2 = vrot.slane %v686_v1, 4 }
 0x4ec   :  { %v688_v3 = vadd.f32 %v687_v2, %v686_v1 }
 0x4ee   :  { %v689_v4 = vrot.slane %v688_v3, 2 }
 0x4f0   :  { %v690_v5 = vadd.f32 %v689_v4, %v688_v3 }
 0x4f2   :  { %v691_v6 = vrot.slane %v690_v5, 1 }
 0x4f4   :  { %v692_v7 = vadd.f32 %v691_v6, %v690_v5 }
 0x4f6   :  { %1149 = vrcp.f32 %v692_v7 }
 0x500   :  { %v1150_v8 = vpop.eup %1149 }
 0x501   :  { %v695_v9 = vmul.f32 %v1150_v8, %v1146_v59  ;;  %v694_v10 = vmul.f32 %v1150_v8, %v1144_v58  ;;  %v696_v12 = vmul.f32 %v1150_v8, %v1148_v61 }
 0x503   :  { %702 = vrot.lane.b32.xlu1 %v695_v9, %s1281_s1  ;;  %700 = vrot.lane.b32.xlu0 %v694_v10, %s1281_s1 }
 0x507   :  { %704 = vrot.lane.b32.xlu0 %v696_v12, %s1281_s1 }
 0x575   :  { %v703_v17 = vpop.permute.xlu1 %702  ;;  %v701_v18 = vpop.permute.xlu0 %700 }
 0x576   :  { %v710_v19 = vmul.f32 %v703_v17, %v1476_v52  ;;  %v709_v20 = vmul.f32 %v701_v18, %v1466_v47 }
 0x578   :  { %v1137_v22 = vpack.i.bf16 %v710_v19, %v709_v20 }
 0x579   :  { %v705_v11 = vpop.permute.xlu0 %704 }
 0x57a   :  { %v711_v23 = vmul.f32 %v705_v11, %v1481_v54  ;;  %1138 = vrot.lane.b32.xlu1 %v1137_v22, %s1281_s1  ;;  %v821_v54 = vld [vmem:[%s1575_s7 + $0x8] sm:$0xff] }
 0x57b   :  { %v1104_v30 = vpack.c.bf16 %v821_v54, %v820_v26 }
 0x57c   :  { %733 = vrot.lane.b32.xlu0 %v711_v23, %s1281_s1 }
 0x57e   :  { %914 = vrot.lane.b32.xlu1 %v1433_v29, %s1282_s21  ;;  %v822_v29 = vld [vmem:[%s1575_s7 + $0x10] sm:$0xff] }
 0x580   :  { %916 = vrot.lane.b32.xlu0 %v1431_v28, %s1282_s21  ;;  %v823_v28 = vld [vmem:[%s1575_s7 + $0x18] sm:$0xff] }
 0x581   :  { %v1108_v32 = vpack.c.bf16 %v823_v28, %v822_v29 }
 0x5ec   :  { %v1139_v47 = vpop.permute.xlu1 %1138 }
 0x5ed   :  { %v1141_v52 = vunpack.i.h.bf16 %v1139_v47  ;;  %v1140_v24 = vunpack.i.l.bf16 %v1139_v47 }
 0x5ee   :  { %v734_v27 = vpop.permute.xlu0 %733 }
 0x5ef   :  { %v1100_v25 = vpack.c.bf16 %v1141_v52, %v1140_v24 }
 0x5f0   :  { %v915_v40 = vpop.permute.xlu1 %914 }
 0x5f1   :  { %1101 = vmatprep.subr.bf16.mxu0 %v1100_v25 }
 0x5f2   :  { %1103 = vmatpush3.bf16.msra.mxu0 %v1100_v25  ;;  %v917_v38 = vpop.permute.xlu0 %916 }
 0x5f3   :  { %1068 = vmatprep.subr.mxu0 %v734_v27 }
 0x5f6   :  { %1069 = vmatpush3.msra.mxu0 %v734_v27 }
 0x5f7   :  { %1071 = vmatmul.mubr.msk.f32.vlgmr.msra.gmra.mrb[8].mxu0 %vm738_vm3, %v968_v31  ;;  %1105 = vmatprep.subr.bf16.mxu0 %v1104_v30 }
 0x5f8   :  { %1107 = vmatpush3.bf16.msra.mxu0 %v1104_v30 }
 0x5f9   :  { %1109 = vmatprep.subr.bf16.mxu0 %v1108_v32 }
 0x5fc   :  { %1111 = vmatpush3.bf16.msra.mxu0 %v1108_v32 }
 0x6ca   :  { %v1072_v33 = vpop.f32.mrb[8].mxu0 }
 0x6cb   :  { %v811_v34 = vpop.f32.mrb[9].mxu0 }
 0x6cc   :  { %1081 = vmatprep.mubr.msk.f32.mxu0 %vm563_vm13, %v811_v34 }
 0x6cd   :  { %1082 = vmatmul.mubr.msk.f32.vlgmr.msra.gmra.mrb[10].mxu0 %vm563_vm13, %v1072_v33 }
 0x7a0   :  { %v1083_v36 = vpop.f32.mrb[10].mxu0 }
 0x7a1   :  { %v909_v14 = vadd.f32 %v1083_v36, %v971_v35  ;;  %v903_v37 = vpop.f32.mrb[11].mxu0 }
 0x7a2   :  { %v904_v39 = vadd.f32 %v971_v35, %v903_v37 }
 0x7a3   :  { %v921_v41 = vadd.f32 %v917_v38, %v909_v14 }
 0x7a4   :  { %v920_v42 = vadd.f32 %v915_v40, %v904_v39 }
 0x7a5   :  { %923 = vst.msk [vmem:[#allocation10 + $0x8] sm:$0xff] %vm563_vm13, %v921_v41 }
 0x7a6   :  { %922 = vst.msk [vmem:[#allocation10] sm:$0xff] %vm563_vm13, %v920_v42 }
 0x7a7   :  { %1250 = shalt.err (!%p1247_p8)
}
 0x7a8   :  { %s1251_s16 = scalar_lea.hbm %s1578_s10, 256 }
 0x7a9   :  { %p1252_p9 = scmp.ne.s32.totalorder %s1578_s10, %s1251_s16  ;;  %p1255_p10 = scmp.lt.u32.totalorder %s1251_s16, %s1578_s10 }
 0x7ab   :  { %p1257_p11 = pnand %p1255_p10, %p1252_p9 }
 0x7ad   :  { %1260 = shalt.err (!%p1257_p11)
}
 0x7ae   :  { %935 = dma.vmem_to_hbm [thread:$0]  %s930_s28, 256, %s1578_s10, [#allocation4], %s1271_s4, %s1271_s4, %s1272_s14  }
 0x7af   :  { %1267 = dma.done.wait [#allocation4], 256  }
 0x7b0   :  { %1268 = vsyncadd [#allocation4], 4294967040 }
 0x7b1   :  { %939 = vsyncpa [#allocation3], 1 }
 0x7b2   :  { %940 = vsyncpa [#allocation6], 1 }
 0x7b3   :  { %941 = vsyncpa [#allocation9], 1 }
 0x7b4   :  { %942 = vsyncpa [#allocation4], 1 }

</bundles_post_ra>
